<compile_context>
chip_gen: v7x
topology: tpu7x:2x2x1
jax: 0.10.0
libtpu: 0.0.40
codegen_flags: <defaults>
</compile_context>

<pallas_src>
import jax
import jax.numpy as jnp
from jax.experimental import pallas as pl
from jax.experimental.pallas import tpu as pltpu


# ----------------------------- kernels --------------------------------------

def _make_list_kernel(n_layers):
    """List-input path: one grid step = full weighted sum over all L layer
    blocks for one row tile.  w_ref: (L,) normalized weights in SMEM.
    refs[:L]: (tile_r, H) blocks (native dtype).  refs[L]: (tile_r, H) out."""
    def kernel(w_ref, *refs):
        x_refs = refs[:n_layers]
        o_ref = refs[n_layers]
        acc = w_ref[0] * x_refs[0][...].astype(jnp.float32)
        for l in range(1, n_layers):
            acc = acc + w_ref[l] * x_refs[l][...].astype(jnp.float32)
        o_ref[...] = acc.astype(o_ref.dtype)
    return kernel


def _stacked_kernel(w_ref, x_ref, o_ref, acc_ref):
    """Stacked-input path: grid = (row_tiles, L); layer axis is the trailing
    'arbitrary' reduction accumulating into an f32 VMEM scratch.
    w_ref: (L,) SMEM.  x_ref: (1, tile_r, H) native dtype.  o_ref: (tile_r, H).
    acc_ref: (tile_r, H) f32 scratch."""
    l = pl.program_id(1)
    contrib = w_ref[l] * x_ref[0].astype(jnp.float32)

    @pl.when(l == 0)
    def _():
        acc_ref[...] = contrib

    @pl.when(l != 0)
    def _():
        acc_ref[...] = acc_ref[...] + contrib

    @pl.when(l == pl.num_programs(1) - 1)
    def _():
        o_ref[...] = acc_ref[...].astype(o_ref.dtype)


# ----------------------------- tiling helper --------------------------------

_VMEM_BUDGET = 24 * 1024 * 1024   # live-buffer target; safe on v5e/v6e/v7x
_MAX_TILE_R = 2048


def _pick_tile_r(R, per_row_bytes):
    """Row-tile size: sublane-aligned, fits the VMEM budget, keeps >=2 row
    tiles for v7x's two TensorCores, and prefers a divisor of R (no ragged
    tail).  Falls back to Pallas edge-block masking otherwise."""
    if R <= 8:
        return R
    cap = min(_MAX_TILE_R, _VMEM_BUDGET // max(per_row_bytes, 1))
    cap = min(cap, pl.cdiv(R, 2))          # >= 2 row tiles (megacore)
    cap = max(8, (cap // 8) * 8)           # sublane-aligned
    cap = min(cap, R)
    if cap == R:
        return R
    for t in range(cap, 7, -8):            # prefer a tile that divides R
        if R % t == 0:
            return t
    return cap                             # ragged tail handled by edge masking


# ----------------------------- wrappers --------------------------------------

def _wlp_from_list(layer_list, w_norm):
    """layer_list: L arrays of (B, S, H), native dtype.  No stack/pad/upcast."""
    L = len(layer_list)
    B, S, H = layer_list[0].shape
    dtype = layer_list[0].dtype
    R = B * S
    xs = [x.reshape(R, H) for x in layer_list]        # contiguous -> free reshape

    itemsize = jnp.dtype(dtype).itemsize
    # 2 buffers per streamed input (L of them) + 2 output buffers, per row.
    per_row = H * (2 * L * itemsize + 2 * itemsize)
    tile_r = _pick_tile_r(R, per_row)
    vmem_need = per_row * tile_r

    spec = pl.BlockSpec((tile_r, H), lambda i, w: (i, 0))
    out = pl.pallas_call(
        _make_list_kernel(L),
        out_shape=jax.ShapeDtypeStruct((R, H), dtype),
        grid_spec=pltpu.PrefetchScalarGridSpec(
            num_scalar_prefetch=1,
            grid=(pl.cdiv(R, tile_r),),
            in_specs=[spec] * L,
            out_specs=pl.BlockSpec((tile_r, H), lambda i, w: (i, 0)),
        ),
        compiler_params=pltpu.CompilerParams(
            dimension_semantics=("parallel",),
            vmem_limit_bytes=int(vmem_need + 8 * 1024 * 1024)),
    )(w_norm, *xs)
    return out.reshape(B, S, H)


def _wlp_from_stacked(stacked, w_norm, layers):
    """stacked: (L_total, B, S, H), native dtype.  The 'last `layers`' slice is
    folded into the index_map (static offset) -> no slice copy."""
    L_total, B, S, H = stacked.shape
    dtype = stacked.dtype
    R = B * S
    off = L_total - layers
    x = stacked.reshape(L_total, R, H)                 # contiguous -> free reshape

    itemsize = jnp.dtype(dtype).itemsize
    # 2 input buffers + 2 output buffers + 1 f32 scratch accumulator, per row.
    per_row = H * (2 * itemsize + 2 * itemsize + 4)
    tile_r = _pick_tile_r(R, per_row)
    vmem_need = per_row * tile_r

    out = pl.pallas_call(
        _stacked_kernel,
        out_shape=jax.ShapeDtypeStruct((R, H), dtype),
        grid_spec=pltpu.PrefetchScalarGridSpec(
            num_scalar_prefetch=1,
            grid=(pl.cdiv(R, tile_r), layers),         # reduction (L) axis last
            in_specs=[pl.BlockSpec((1, tile_r, H),
                                   lambda i, l, w: (l + off, i, 0))],
            out_specs=pl.BlockSpec((tile_r, H), lambda i, l, w: (i, 0)),
            scratch_shapes=[pltpu.VMEM((tile_r, H), jnp.float32)],
        ),
        compiler_params=pltpu.CompilerParams(
            dimension_semantics=("parallel", "arbitrary"),
            vmem_limit_bytes=int(vmem_need + 8 * 1024 * 1024)),
    )(w_norm, x)
    return out.reshape(B, S, H)


def weighted_layer_pooling(all_hidden_states, layer_weights, *, layers=12):
    """all_hidden_states: list/tuple of (B, S, H) arrays (torch-style) or an
    already-stacked (L_total, B, S, H) array.  layer_weights: (layers,).
    Returns (B, S, H) in the input dtype."""
    w = layer_weights.astype(jnp.float32)
    w_norm = w / jnp.sum(w)                            # fold /sum(w) into weights
    if isinstance(all_hidden_states, (list, tuple)):
        sel = list(all_hidden_states)[-layers:]
        return _wlp_from_list(sel, w_norm)
    return _wlp_from_stacked(all_hidden_states, w_norm, layers)


# ----------------------------- reference & test ------------------------------

def _reference_wlp(all_hidden_states, layer_weights, layers=12):
    stacked = jnp.stack(all_hidden_states, axis=0)
    x = stacked[-layers:].astype(jnp.float32)
    w = layer_weights.astype(jnp.float32)
    return (w[:, None, None, None] * x).sum(axis=0) / jnp.sum(w)


if __name__ == "__main__":
    # 13 hidden states (embeddings + 12 transformer layers), layers=12,
    # batch=2, seq=8, hidden=128.
    LAYERS, L_TOTAL, B, S, H = 12, 13, 2, 8, 128

    key = jax.random.PRNGKey(0)
    k_h, k_w = jax.random.split(key, 2)

    stacked = jax.random.normal(k_h, (L_TOTAL, B, S, H), dtype=jnp.float32)
    all_hidden_states = [stacked[i] for i in range(L_TOTAL)]
    # module initializes weights to ones; use non-trivial positive weights so
    # the normalization path is actually exercised.
    layer_weights = jax.random.uniform(
        k_w, (LAYERS,), minval=0.5, maxval=1.5, dtype=jnp.float32)

    # List-of-layers path (matches the torch forward signature).
    out_list = weighted_layer_pooling(all_hidden_states, layer_weights,
                                      layers=LAYERS)
    out_list = jax.block_until_ready(out_list)

    # Pre-stacked path.
    out_stacked = weighted_layer_pooling(stacked, layer_weights, layers=LAYERS)
    out_stacked = jax.block_until_ready(out_stacked)

    ref = _reference_wlp(all_hidden_states, layer_weights, layers=LAYERS)
    assert out_list.shape == (B, S, H)
    assert jnp.allclose(out_list, ref, atol=1e-5, rtol=1e-5), \
        "list-path mismatch vs. reference WeightedLayerPooling"
    assert jnp.allclose(out_stacked, ref, atol=1e-5, rtol=1e-5), \
        "stacked-path mismatch vs. reference WeightedLayerPooling"

    print("KERNEL_OK")
</pallas_src>

<mosaic_0001>
module attributes {stable_mosaic.version = 11 : i64} {
  func.func @kernel(%arg0: i32, %arg1: memref<12xf32, #tpu.memory_space<smem>>, %arg2: memref<8x128xf32, #tpu.memory_space<vmem>>, %arg3: memref<8x128xf32, #tpu.memory_space<vmem>>, %arg4: memref<8x128xf32, #tpu.memory_space<vmem>>, %arg5: memref<8x128xf32, #tpu.memory_space<vmem>>, %arg6: memref<8x128xf32, #tpu.memory_space<vmem>>, %arg7: memref<8x128xf32, #tpu.memory_space<vmem>>, %arg8: memref<8x128xf32, #tpu.memory_space<vmem>>, %arg9: memref<8x128xf32, #tpu.memory_space<vmem>>, %arg10: memref<8x128xf32, #tpu.memory_space<vmem>>, %arg11: memref<8x128xf32, #tpu.memory_space<vmem>>, %arg12: memref<8x128xf32, #tpu.memory_space<vmem>>, %arg13: memref<8x128xf32, #tpu.memory_space<vmem>>, %arg14: memref<8x128xf32, #tpu.memory_space<vmem>>) attributes {dimension_semantics = [#tpu.dimension_semantics<parallel>], iteration_bounds = array<i64: 2>, scalar_prefetch = 1 : i64, scratch_operands = 0 : i64, tpu.core_type = #tpu.core_type<tc>, window_params = [{transform_indices = @transform_0, window_bounds = array<i64: 8, 128>}, {transform_indices = @transform_1, window_bounds = array<i64: 8, 128>}, {transform_indices = @transform_2, window_bounds = array<i64: 8, 128>}, {transform_indices = @transform_3, window_bounds = array<i64: 8, 128>}, {transform_indices = @transform_4, window_bounds = array<i64: 8, 128>}, {transform_indices = @transform_5, window_bounds = array<i64: 8, 128>}, {transform_indices = @transform_6, window_bounds = array<i64: 8, 128>}, {transform_indices = @transform_7, window_bounds = array<i64: 8, 128>}, {transform_indices = @transform_8, window_bounds = array<i64: 8, 128>}, {transform_indices = @transform_9, window_bounds = array<i64: 8, 128>}, {transform_indices = @transform_10, window_bounds = array<i64: 8, 128>}, {transform_indices = @transform_11, window_bounds = array<i64: 8, 128>}, {transform_indices = @transform_12, window_bounds = array<i64: 8, 128>}]} {
    %c0 = arith.constant 0 : index
    %0 = memref.load %arg1[%c0] : memref<12xf32, #tpu.memory_space<smem>>
    %c0_0 = arith.constant 0 : index
    %c0_1 = arith.constant 0 : index
    %1 = vector.load %arg2[%c0_0, %c0_1] : memref<8x128xf32, #tpu.memory_space<vmem>>, vector<8x128xf32>
    %2 = vector.broadcast %0 : f32 to vector<8x128xf32>
    %3 = arith.mulf %2, %1 : vector<8x128xf32>
    %c1 = arith.constant 1 : index
    %4 = memref.load %arg1[%c1] : memref<12xf32, #tpu.memory_space<smem>>
    %c0_2 = arith.constant 0 : index
    %c0_3 = arith.constant 0 : index
    %5 = vector.load %arg3[%c0_2, %c0_3] : memref<8x128xf32, #tpu.memory_space<vmem>>, vector<8x128xf32>
    %6 = vector.broadcast %4 : f32 to vector<8x128xf32>
    %7 = arith.mulf %6, %5 : vector<8x128xf32>
    %8 = arith.addf %3, %7 : vector<8x128xf32>
    %c2 = arith.constant 2 : index
    %9 = memref.load %arg1[%c2] : memref<12xf32, #tpu.memory_space<smem>>
    %c0_4 = arith.constant 0 : index
    %c0_5 = arith.constant 0 : index
    %10 = vector.load %arg4[%c0_4, %c0_5] : memref<8x128xf32, #tpu.memory_space<vmem>>, vector<8x128xf32>
    %11 = vector.broadcast %9 : f32 to vector<8x128xf32>
    %12 = arith.mulf %11, %10 : vector<8x128xf32>
    %13 = arith.addf %8, %12 : vector<8x128xf32>
    %c3 = arith.constant 3 : index
    %14 = memref.load %arg1[%c3] : memref<12xf32, #tpu.memory_space<smem>>
    %c0_6 = arith.constant 0 : index
    %c0_7 = arith.constant 0 : index
    %15 = vector.load %arg5[%c0_6, %c0_7] : memref<8x128xf32, #tpu.memory_space<vmem>>, vector<8x128xf32>
    %16 = vector.broadcast %14 : f32 to vector<8x128xf32>
    %17 = arith.mulf %16, %15 : vector<8x128xf32>
    %18 = arith.addf %13, %17 : vector<8x128xf32>
    %c4 = arith.constant 4 : index
    %19 = memref.load %arg1[%c4] : memref<12xf32, #tpu.memory_space<smem>>
    %c0_8 = arith.constant 0 : index
    %c0_9 = arith.constant 0 : index
    %20 = vector.load %arg6[%c0_8, %c0_9] : memref<8x128xf32, #tpu.memory_space<vmem>>, vector<8x128xf32>
    %21 = vector.broadcast %19 : f32 to vector<8x128xf32>
    %22 = arith.mulf %21, %20 : vector<8x128xf32>
    %23 = arith.addf %18, %22 : vector<8x128xf32>
    %c5 = arith.constant 5 : index
    %24 = memref.load %arg1[%c5] : memref<12xf32, #tpu.memory_space<smem>>
    %c0_10 = arith.constant 0 : index
    %c0_11 = arith.constant 0 : index
    %25 = vector.load %arg7[%c0_10, %c0_11] : memref<8x128xf32, #tpu.memory_space<vmem>>, vector<8x128xf32>
    %26 = vector.broadcast %24 : f32 to vector<8x128xf32>
    %27 = arith.mulf %26, %25 : vector<8x128xf32>
    %28 = arith.addf %23, %27 : vector<8x128xf32>
    %c6 = arith.constant 6 : index
    %29 = memref.load %arg1[%c6] : memref<12xf32, #tpu.memory_space<smem>>
    %c0_12 = arith.constant 0 : index
    %c0_13 = arith.constant 0 : index
    %30 = vector.load %arg8[%c0_12, %c0_13] : memref<8x128xf32, #tpu.memory_space<vmem>>, vector<8x128xf32>
    %31 = vector.broadcast %29 : f32 to vector<8x128xf32>
    %32 = arith.mulf %31, %30 : vector<8x128xf32>
    %33 = arith.addf %28, %32 : vector<8x128xf32>
    %c7 = arith.constant 7 : index
    %34 = memref.load %arg1[%c7] : memref<12xf32, #tpu.memory_space<smem>>
    %c0_14 = arith.constant 0 : index
    %c0_15 = arith.constant 0 : index
    %35 = vector.load %arg9[%c0_14, %c0_15] : memref<8x128xf32, #tpu.memory_space<vmem>>, vector<8x128xf32>
    %36 = vector.broadcast %34 : f32 to vector<8x128xf32>
    %37 = arith.mulf %36, %35 : vector<8x128xf32>
    %38 = arith.addf %33, %37 : vector<8x128xf32>
    %c8 = arith.constant 8 : index
    %39 = memref.load %arg1[%c8] : memref<12xf32, #tpu.memory_space<smem>>
    %c0_16 = arith.constant 0 : index
    %c0_17 = arith.constant 0 : index
    %40 = vector.load %arg10[%c0_16, %c0_17] : memref<8x128xf32, #tpu.memory_space<vmem>>, vector<8x128xf32>
    %41 = vector.broadcast %39 : f32 to vector<8x128xf32>
    %42 = arith.mulf %41, %40 : vector<8x128xf32>
    %43 = arith.addf %38, %42 : vector<8x128xf32>
    %c9 = arith.constant 9 : index
    %44 = memref.load %arg1[%c9] : memref<12xf32, #tpu.memory_space<smem>>
    %c0_18 = arith.constant 0 : index
    %c0_19 = arith.constant 0 : index
    %45 = vector.load %arg11[%c0_18, %c0_19] : memref<8x128xf32, #tpu.memory_space<vmem>>, vector<8x128xf32>
    %46 = vector.broadcast %44 : f32 to vector<8x128xf32>
    %47 = arith.mulf %46, %45 : vector<8x128xf32>
    %48 = arith.addf %43, %47 : vector<8x128xf32>
    %c10 = arith.constant 10 : index
    %49 = memref.load %arg1[%c10] : memref<12xf32, #tpu.memory_space<smem>>
    %c0_20 = arith.constant 0 : index
    %c0_21 = arith.constant 0 : index
    %50 = vector.load %arg12[%c0_20, %c0_21] : memref<8x128xf32, #tpu.memory_space<vmem>>, vector<8x128xf32>
    %51 = vector.broadcast %49 : f32 to vector<8x128xf32>
    %52 = arith.mulf %51, %50 : vector<8x128xf32>
    %53 = arith.addf %48, %52 : vector<8x128xf32>
    %c11 = arith.constant 11 : index
    %54 = memref.load %arg1[%c11] : memref<12xf32, #tpu.memory_space<smem>>
    %c0_22 = arith.constant 0 : index
    %c0_23 = arith.constant 0 : index
    %55 = vector.load %arg13[%c0_22, %c0_23] : memref<8x128xf32, #tpu.memory_space<vmem>>, vector<8x128xf32>
    %56 = vector.broadcast %54 : f32 to vector<8x128xf32>
    %57 = arith.mulf %56, %55 : vector<8x128xf32>
    %58 = arith.addf %53, %57 : vector<8x128xf32>
    %c0_24 = arith.constant 0 : index
    %c0_25 = arith.constant 0 : index
    %59 = vector.load %arg14[%c0_24, %c0_25] : memref<8x128xf32, #tpu.memory_space<vmem>>, vector<8x128xf32>
    tpu.vector_store %arg14[%c0_24, %c0_25], %58 {strides = array<i32>} : memref<8x128xf32, #tpu.memory_space<vmem>>, vector<8x128xf32>,
    return
  }
  func.func @transform_0(%arg0: i32, %arg1: memref<12xf32, #tpu.memory_space<smem>>) -> (i32, i32) {
    %c0_i32 = arith.constant 0 : i32
    %c0_i32_0 = arith.constant 0 : i32
    return %arg0, %c0_i32 : i32, i32
  }
  func.func @transform_1(%arg0: i32, %arg1: memref<12xf32, #tpu.memory_space<smem>>) -> (i32, i32) {
    %c0_i32 = arith.constant 0 : i32
    %c0_i32_0 = arith.constant 0 : i32
    return %arg0, %c0_i32 : i32, i32
  }
  func.func @transform_2(%arg0: i32, %arg1: memref<12xf32, #tpu.memory_space<smem>>) -> (i32, i32) {
    %c0_i32 = arith.constant 0 : i32
    %c0_i32_0 = arith.constant 0 : i32
    return %arg0, %c0_i32 : i32, i32
  }
  func.func @transform_3(%arg0: i32, %arg1: memref<12xf32, #tpu.memory_space<smem>>) -> (i32, i32) {
    %c0_i32 = arith.constant 0 : i32
    %c0_i32_0 = arith.constant 0 : i32
    return %arg0, %c0_i32 : i32, i32
  }
  func.func @transform_4(%arg0: i32, %arg1: memref<12xf32, #tpu.memory_space<smem>>) -> (i32, i32) {
    %c0_i32 = arith.constant 0 : i32
    %c0_i32_0 = arith.constant 0 : i32
    return %arg0, %c0_i32 : i32, i32
  }
  func.func @transform_5(%arg0: i32, %arg1: memref<12xf32, #tpu.memory_space<smem>>) -> (i32, i32) {
    %c0_i32 = arith.constant 0 : i32
    %c0_i32_0 = arith.constant 0 : i32
    return %arg0, %c0_i32 : i32, i32
  }
  func.func @transform_6(%arg0: i32, %arg1: memref<12xf32, #tpu.memory_space<smem>>) -> (i32, i32) {
    %c0_i32 = arith.constant 0 : i32
    %c0_i32_0 = arith.constant 0 : i32
    return %arg0, %c0_i32 : i32, i32
  }
  func.func @transform_7(%arg0: i32, %arg1: memref<12xf32, #tpu.memory_space<smem>>) -> (i32, i32) {
    %c0_i32 = arith.constant 0 : i32
    %c0_i32_0 = arith.constant 0 : i32
    return %arg0, %c0_i32 : i32, i32
  }
  func.func @transform_8(%arg0: i32, %arg1: memref<12xf32, #tpu.memory_space<smem>>) -> (i32, i32) {
    %c0_i32 = arith.constant 0 : i32
    %c0_i32_0 = arith.constant 0 : i32
    return %arg0, %c0_i32 : i32, i32
  }
  func.func @transform_9(%arg0: i32, %arg1: memref<12xf32, #tpu.memory_space<smem>>) -> (i32, i32) {
    %c0_i32 = arith.constant 0 : i32
    %c0_i32_0 = arith.constant 0 : i32
    return %arg0, %c0_i32 : i32, i32
  }
  func.func @transform_10(%arg0: i32, %arg1: memref<12xf32, #tpu.memory_space<smem>>) -> (i32, i32) {
    %c0_i32 = arith.constant 0 : i32
    %c0_i32_0 = arith.constant 0 : i32
    return %arg0, %c0_i32 : i32, i32
  }
  func.func @transform_11(%arg0: i32, %arg1: memref<12xf32, #tpu.memory_space<smem>>) -> (i32, i32) {
    %c0_i32 = arith.constant 0 : i32
    %c0_i32_0 = arith.constant 0 : i32
    return %arg0, %c0_i32 : i32, i32
  }
  func.func @transform_12(%arg0: i32, %arg1: memref<12xf32, #tpu.memory_space<smem>>) -> (i32, i32) {
    %c0_i32 = arith.constant 0 : i32
    %c0_i32_0 = arith.constant 0 : i32
    return %arg0, %c0_i32 : i32, i32
  }
}

</mosaic_0001>

<bundles_post_ra>
// kernel: tpu_custom_call.1
= control target key start
LH: loop header
LB: loop body
LE: loop exit
PB: predicated region body
PF: predicated region fallthrough
CT: control target
= control target key end

     0   :  { %s2283_s0 = inlined_call_operand.hbm [shape: f32[12], index: 0, kind: input, shape index: {}]   ;;  %s2284_s1 = inlined_call_operand.hbm [shape: f32[16,128], index: 1, kind: input, shape index: {}]   ;;  %s2285_s2 = inlined_call_operand.hbm [shape: f32[16,128], index: 2, kind: input, shape index: {}]   ;;  %s2286_s3 = inlined_call_operand.hbm [shape: f32[16,128], index: 3, kind: input, shape index: {}]   ;;  %s2287_s4 = inlined_call_operand.hbm [shape: f32[16,128], index: 4, kind: input, shape index: {}]   ;;  %s2288_s5 = inlined_call_operand.vmem [shape: f32[16,128], index: 5, kind: input, shape index: {}]   ;;  %s2289_s6 = inlined_call_operand.hbm [shape: f32[16,128], index: 6, kind: input, shape index: {}]   ;;  %s2290_s7 = inlined_call_operand.hbm [shape: f32[16,128], index: 7, kind: input, shape index: {}]   ;;  %s2291_s8 = inlined_call_operand.hbm [shape: f32[16,128], index: 8, kind: input, shape index: {}]   ;;  %s2292_s9 = inlined_call_operand.vmem [shape: f32[16,128], index: 9, kind: input, shape index: {}]   ;;  %s2293_s10 = inlined_call_operand.hbm [shape: f32[16,128], index: 10, kind: input, shape index: {}]   ;;  %s2294_s11 = inlined_call_operand.hbm [shape: f32[16,128], index: 11, kind: input, shape index: {}]   ;;  %s2295_s12 = inlined_call_operand.hbm [shape: f32[16,128], index: 12, kind: input, shape index: {}]   ;;  %s2296_s13 = inlined_call_operand.hbm [shape: f32[16,128], index: 13, kind: output, shape index: {}]  }
   0x1   :  { %2311 = sst [smem:[#allocation37_spill]] %s2284_s1  ;;  %s1296_s27 = scalar_lea.hbm %s2283_s0, 16 }
   0x2   :  { %2312 = sst [smem:[#allocation38_spill]] %s2285_s2  ;;  %p1297_p0 = scmp.ne.s32.totalorder %s2283_s0, %s1296_s27 }
   0x3   :  { %2313 = sst [smem:[#allocation39_spill]] %s2287_s4  ;;  %p1300_p1 = scmp.lt.u32.totalorder %s1296_s27, %s2283_s0 }
   0x4   :  { %2314 = sst [smem:[#allocation40_spill]] %s2290_s7 }
   0x5   :  { %2315 = sst [smem:[#allocation41_spill]] %s2292_s9  ;;  %p1302_p2 = pnand %p1300_p1, %p1297_p0 }
   0x6   :  { %2316 = sst [smem:[#allocation42_spill]] %s2293_s10 }
   0x7   :  { %2317 = sst [smem:[#allocation43_spill]] %s2296_s13 }
   0x8   :  { %1305 = shalt.err (!%p1302_p2)  }
   0x9   :  { %s1696_s15 = smov [#allocation3]  }
   0xa   :  { %19 = dma.hbm_to_smem %s2283_s0, 16, %s1696_s15, [#allocation2] }
   0xb   :  { %1650 = dma.done.wait [#allocation2], 16 }
   0xc   :  { %1651 = vsyncadd [#allocation2], 4294967280 }
   0xd   :  { %21 = sfence }
   0xe   :  { %22 = vsyncpa [#allocation5], 0 }
   0xf   :  { %24 = vsyncpa [#allocation5 + $0x1], 0 }
  0x10   :  { %25 = vsyncpa [#allocation8], 0 }
  0x11   :  { %27 = vsyncpa [#allocation8 + $0x1], 0 }
  0x12   :  { %28 = vsyncpa [#allocation11], 0 }
  0x13   :  { %30 = vsyncpa [#allocation11 + $0x1], 0 }
  0x14   :  { %31 = vsyncpa [#allocation14], 0 }
  0x15   :  { %33 = vsyncpa [#allocation14 + $0x1], 0 }
  0x16   :  { %34 = vsyncpa [#allocation17], 0 }
  0x17   :  { %36 = vsyncpa [#allocation17 + $0x1], 0 }
  0x18   :  { %37 = vsyncpa [#allocation20], 0 }
  0x19   :  { %39 = vsyncpa [#allocation20 + $0x1], 0 }
  0x1a   :  { %40 = vsyncpa [#allocation6], 0 }
  0x1b   :  { %42 = vsyncpa [#allocation6 + $0x1], 0  ;;  %s1790_s18 = smov 0   ;;  %s1792_s0 = smov 0  }
  0x1c   :  { %s1794_s19 = smov 0   ;;  %s1796_s20 = smov 0  }
  0x1d LB: > { %2318 = sst [smem:[#allocation30_spill]] %s1682_s18  ;;  %s1811_s21 = sadd.s32 4294967295, %s1694_s20   ;;  %s1694_s20 = sphi %s1796_s20, %s2367_s20   ;;  %s1690_s19 = sphi %s1794_s19, %s2369_s19   ;;  %s1686_s0 = sphi %s1792_s0, %s2371_s0   ;;  %s1682_s18 = sphi %s1790_s18, %s2370_s18  }
  0x1e   : > { %2319 = sst [smem:[#allocation31_spill]] %s1690_s19  ;;  %s1152_s22 = sadd.s32 4294967294, %s1694_s20  }
  0x1f   : > { %2320 = sst [smem:[#allocation32_spill]] %s1694_s20  ;;  %s1815_s23 = sadd.s32 1, %s1694_s20  }
  0x20   : > { %2321 = sst [smem:[#allocation33_spill]] %s1815_s23  ;;  %s55_s24 = sadd.s32 1, %s1690_s19 }
  0x21   : > { %s52_s25 = ssub.s32 %s1694_s20, %s1815_s23  ;;  %p62_p3 = scmp.ne.s32.totalorder %s1690_s19, %s1686_s0 }
  0x22   : > { %p53_p4 = scmp.eq.s32.totalorder %s52_s25, 0  ;;  %p63_p5 = scmp.eq.s32.totalorder %s1694_s20, 0 }
  0x23   : > { %p68_p6 = scmp.ne.s32.totalorder %s1686_s0, %s1682_s18  ;;  %p69_p7 = scmp.eq.s32.totalorder %s1811_s21, 0 }
  0x24   : > { %s1827_s26 = scalar_select %p53_p4, %s1690_s19, %s55_s24  }
  0x25   : > { %p64_p8 = por %p63_p5, %p62_p3  ;;  %p1829_p9 = por %p69_p7, %p68_p6 }
  0x26   : > { %2322 = sst [smem:[#allocation34_spill]] %s1827_s26  ;;  %p378_p10 = scmp.eq.s32.totalorder %s1811_s21, 1 }
  0x27   : > { %s2323_s27 = scalar_select %p1829_p9, 1, 0 }
  0x28   : > { %p384_p11 = scmp.eq.s32.totalorder %s1152_s22, 1  ;;  %p1261_p13 = scmp.lt.s32.totalorder %s1694_s20, 2 }
  0x29   : > { %p1836_p0 = por %p378_p10, %p62_p3  ;;  %s1845_s30 = sand.u32 1, %s1690_s19  }
  0x2a   : > { %p1840_p1 = por %p384_p11, %p68_p6  ;;  %s1848_s14 = sshll.u32 %s1694_s20, 7 }
  0x2b   : > { %s2324_s28 = scalar_select %p1836_p0, 1, 0 }
  0x2c   : > { %s2326_s29 = scalar_select %p1840_p1, 1, 0 }
  0x2d   : > { %2325 = sst [smem:[#allocation35_spill]] %s2324_s28  ;;  %s1851_s15 = sshll.u32 %s1845_s30, 3 }
  0x2e   : > { %2327 = sst [smem:[#allocation36_spill]] %s2326_s29  ;;  %p1853_p2 = pnand %p1261_p13, %p64_p8 }
  0x2f   : > { %s1858_s17 = sand.u32 1, %s1694_s20   ;;  %s2329_s2 = sld [smem:[#allocation38_spill]] }
  0x30   : > { %s2328_s16 = scalar_select %p1853_p2, 1, 0 }
  0x31   : > { %s426_s26 = scalar_lea.vmem [#allocation7], %s1851_s15  ;;  %p1875_p5 = pneg %p1853_p2 }
  0x32   : > { %s433_s19 = sshll.u32 %s426_s26, 4  ;;  %s1867_s19 = int_to_ptr.vmem [resolvable:$true] %s433_s19 }
  0x35   : > { %s1864_s25 = scalar_lea.hbm %s2329_s2, %s1848_s14  ;;  %s1311_s13 = scalar_lea.hbm %s2329_s2, 256 }
  0x36   : > { %s1306_s29 = scalar_lea.hbm %s1864_s25, 128  ;;  %p1312_p8 = scmp.lt.u32.totalorder %s1864_s25, %s2329_s2 }
  0x37   : > { %p1307_p4 = scmp.ne.s32.totalorder %s1864_s25, %s1306_s29  ;;  %p1313_p10 = scmp.lt.u32.totalorder %s1311_s13, %s1306_s29 }
  0x38   : > { %p1315_p13 = scmp.lt.u32.totalorder %s1306_s29, %s1864_s25 }
  0x39   : > { %p1309_p6 = pnand %p1875_p5, %p1307_p4  ;;  %p1314_p11 = por %p1313_p10, %p1312_p8 }
  0x3b   : > { %p1310_p7 = pneg %p1309_p6  ;;  %p1316_p12 = por %p1315_p13, %p1314_p11 }
  0x3d   : > { %p1317_p3 = pnand %p1316_p12, %p1310_p7 }
  0x3f   : > { %1320 = shalt.err (!%p1317_p3)
}
  0x40   : > { %s1321_s23 = scalar_lea.vmem %s1867_s19, 128  ;;  %s1697_s22 = smov [#allocation7]  }
  0x41   : > { %p1322_p4 = scmp.ne.s32.totalorder %s1867_s19, %s1321_s23  ;;  %s1326_s24 = sshll.u32 %s1697_s22, 4  ;;  %s1327_s24 = int_to_ptr.vmem [resolvable:$false] %s1326_s24 }
  0x42   : > { %s1328_s28 = scalar_lea.vmem %s1327_s24, 256  ;;  %p1329_p0 = scmp.lt.s32.totalorder %s1867_s19, %s1327_s24 }
  0x43   : > { %p1324_p6 = pnand %p1322_p4, %p1875_p5  ;;  %p1330_p9 = scmp.lt.s32.totalorder %s1328_s28, %s1321_s23 }
  0x45   : > { %p1325_p1 = pneg %p1324_p6  ;;  %p1331_p8 = por %p1330_p9, %p1329_p0 }
  0x47   : > { %p1332_p10 = pnand %p1331_p8, %p1325_p1 }
  0x49   : > { %1335 = shalt.err (!%p1332_p10)
}
  0x4a   : > { %s2331_s13 = scalar_lea.sflag [#allocation8], %s1858_s17  ;;  %p596_p12 = scmp.lt.s32.totalorder %s1694_s20, 3 }
  0x4b   : > { %1232 = dma.hbm_to_vmem [thread:$0]  (!%p1853_p2), %s1864_s25, 128, %s1867_s19, %s2331_s13  }
  0x4c   : > { %s2332_s4 = sld [smem:[#allocation39_spill]]  ;;  %p2333_p9 = scmp.ge.s32.totalorder %s1694_s20, 1 }
  0x4d   : > { %s462_s24 = scalar_lea.vmem [#allocation10], %s1851_s15 }
  0x4e   : > { %p1909_p0 = pnand %p2333_p9, %p596_p12  ;;  %s469_s28 = sshll.u32 %s462_s24, 4  ;;  %s470_s28 = int_to_ptr.vmem [resolvable:$true] %s469_s28 }
  0x50   : > { %s2334_s22 = scalar_select %p1909_p0, 1, 0 }
  0x52   : > { %s1905_s23 = scalar_lea.hbm %s2332_s4, %s1848_s14  ;;  %s1341_s29 = scalar_lea.hbm %s2332_s4, 256 }
  0x53   : > { %s1336_s19 = scalar_lea.hbm %s1905_s23, 128  ;;  %p1342_p11 = scmp.lt.u32.totalorder %s1905_s23, %s2332_s4 }
  0x54   : > { %p1337_p1 = scmp.ne.s32.totalorder %s1905_s23, %s1336_s19  ;;  %p1343_p13 = scmp.lt.u32.totalorder %s1341_s29, %s1336_s19 }
  0x55   : > { %p1345_p6 = scmp.lt.u32.totalorder %s1336_s19, %s1905_s23 }
  0x56   : > { %p1339_p3 = pnand %p1337_p1, %p1875_p5  ;;  %p1344_p4 = por %p1343_p13, %p1342_p11 }
  0x58   : > { %p1340_p7 = pneg %p1339_p3  ;;  %p1346_p8 = por %p1345_p6, %p1344_p4 }
  0x5a   : > { %p1347_p10 = pnand %p1346_p8, %p1340_p7 }
  0x5c   : > { %1350 = shalt.err (!%p1347_p10)
}
  0x5d   : > { %s1351_s24 = scalar_lea.vmem %s470_s28, 128  ;;  %s1698_s2 = smov [#allocation10]  }
  0x5e   : > { %p1352_p12 = scmp.ne.s32.totalorder %s470_s28, %s1351_s24  ;;  %s1356_s9 = sshll.u32 %s1698_s2, 4  ;;  %s1357_s9 = int_to_ptr.vmem [resolvable:$false] %s1356_s9 }
  0x5f   : > { %s1358_s25 = scalar_lea.vmem %s1357_s9, 256  ;;  %p1359_p3 = scmp.lt.s32.totalorder %s470_s28, %s1357_s9 }
  0x60   : > { %p1354_p9 = pnand %p1352_p12, %p1875_p5  ;;  %p1360_p0 = scmp.lt.s32.totalorder %s1358_s25, %s1351_s24 }
  0x62   : > { %p1355_p1 = pneg %p1354_p9  ;;  %p1361_p2 = por %p1360_p0, %p1359_p3 }
  0x64   : > { %p1362_p11 = pnand %p1361_p2, %p1355_p1 }
  0x66   : > { %1365 = shalt.err (!%p1362_p11)
}
  0x67   : > { %p2335_p13 = scmp.ne.s32.totalorder %s2328_s16, 0  ;;  %s2336_s20 = scalar_lea.sflag [#allocation11], %s1858_s17 }
  0x68   : > { %s2337_s7 = sld [smem:[#allocation40_spill]]  ;;  %s505_s9 = scalar_lea.vmem [#allocation13], %s1851_s15 }
  0x69   : > { %1238 = dma.hbm_to_vmem [thread:$0]  (!%p2335_p13), %s1905_s23, 128, %s470_s28, %s2336_s20  }
  0x6a   : > { %s512_s29 = sshll.u32 %s505_s9, 4  ;;  %s513_s29 = int_to_ptr.vmem [resolvable:$true] %s512_s29 }
  0x6e   : > { %s1938_s2 = scalar_lea.hbm %s2337_s7, %s1848_s14  ;;  %s1371_s28 = scalar_lea.hbm %s2337_s7, 256 }
  0x6f   : > { %s1366_s24 = scalar_lea.hbm %s1938_s2, 128  ;;  %p1372_p4 = scmp.lt.u32.totalorder %s1938_s2, %s2337_s7 }
  0x70   : > { %p1367_p2 = scmp.ne.s32.totalorder %s1938_s2, %s1366_s24  ;;  %p1373_p6 = scmp.lt.u32.totalorder %s1371_s28, %s1366_s24 }
  0x71   : > { %p1375_p10 = scmp.lt.u32.totalorder %s1366_s24, %s1938_s2 }
  0x72   : > { %p1369_p0 = pnand %p1367_p2, %p1875_p5  ;;  %p1374_p8 = por %p1373_p6, %p1372_p4 }
  0x74   : > { %p1370_p7 = pneg %p1369_p0  ;;  %p1376_p12 = por %p1375_p10, %p1374_p8 }
  0x76   : > { %p1377_p9 = pnand %p1376_p12, %p1370_p7 }
  0x78   : > { %1380 = shalt.err (!%p1377_p9)
}
  0x79   : > { %s1381_s13 = scalar_lea.vmem %s513_s29, 128  ;;  %s1699_s9 = smov [#allocation13]  }
  0x7a   : > { %p1382_p1 = scmp.ne.s32.totalorder %s513_s29, %s1381_s13  ;;  %s1386_s26 = sshll.u32 %s1699_s9, 4  ;;  %s1387_s26 = int_to_ptr.vmem [resolvable:$false] %s1386_s26 }
  0x7b   : > { %s1388_s25 = scalar_lea.vmem %s1387_s26, 256  ;;  %p1389_p2 = scmp.lt.s32.totalorder %s513_s29, %s1387_s26 }
  0x7c   : > { %p1384_p3 = pnand %p1382_p1, %p1875_p5  ;;  %p1390_p0 = scmp.lt.s32.totalorder %s1388_s25, %s1381_s13 }
  0x7e   : > { %p1385_p11 = pneg %p1384_p3  ;;  %p1391_p13 = por %p1390_p0, %p1389_p2 }
  0x80   : > { %p1392_p4 = pnand %p1391_p13, %p1385_p11 }
  0x82   : > { %1395 = shalt.err (!%p1392_p4)
}
  0x83   : > { %p2338_p6 = scmp.ne.s32.totalorder %s2328_s16, 0  ;;  %s2339_s24 = scalar_lea.sflag [#allocation14], %s1858_s17 }
  0x84   : > { %s2340_s10 = sld [smem:[#allocation42_spill]]  ;;  %s548_s26 = scalar_lea.vmem [#allocation16], %s1851_s15 }
  0x85   : > { %1244 = dma.hbm_to_vmem [thread:$0]  (!%p2338_p6), %s1938_s2, 128, %s513_s29, %s2339_s24  }
  0x86   : > { %s555_s19 = sshll.u32 %s548_s26, 4  ;;  %s556_s19 = int_to_ptr.vmem [resolvable:$true] %s555_s19 }
  0x8a   : > { %s1965_s20 = scalar_lea.hbm %s2340_s10, %s1848_s14  ;;  %s1401_s29 = scalar_lea.hbm %s2340_s10, 256 }
  0x8b   : > { %s1396_s9 = scalar_lea.hbm %s1965_s20, 128  ;;  %p1402_p10 = scmp.lt.u32.totalorder %s1965_s20, %s2340_s10 }
  0x8c   : > { %p1397_p13 = scmp.ne.s32.totalorder %s1965_s20, %s1396_s9  ;;  %p1403_p12 = scmp.lt.u32.totalorder %s1401_s29, %s1396_s9 }
  0x8d   : > { %p1405_p1 = scmp.lt.u32.totalorder %s1396_s9, %s1965_s20 }
  0x8e   : > { %p1399_p7 = pnand %p1397_p13, %p1875_p5  ;;  %p1404_p9 = por %p1403_p12, %p1402_p10 }
  0x90   : > { %p1400_p8 = pneg %p1399_p7  ;;  %p1406_p3 = por %p1405_p1, %p1404_p9 }
  0x92   : > { %p1407_p11 = pnand %p1406_p3, %p1400_p8 }
  0x94   : > { %1410 = shalt.err (!%p1407_p11)
}
  0x95   : > { %s1411_s28 = scalar_lea.vmem %s556_s19, 128  ;;  %s1700_s26 = smov [#allocation16]  }
  0x96   : > { %p1412_p2 = scmp.ne.s32.totalorder %s556_s19, %s1411_s28  ;;  %s1416_s13 = sshll.u32 %s1700_s26, 4  ;;  %s1417_s13 = int_to_ptr.vmem [resolvable:$false] %s1416_s13 }
  0x97   : > { %s1418_s25 = scalar_lea.vmem %s1417_s13, 256  ;;  %p1419_p13 = scmp.lt.s32.totalorder %s556_s19, %s1417_s13 }
  0x98   : > { %p1414_p0 = pnand %p1412_p2, %p1875_p5  ;;  %p1420_p7 = scmp.lt.s32.totalorder %s1418_s25, %s1411_s28 }
  0x9a   : > { %p1415_p4 = pneg %p1414_p0  ;;  %p1421_p6 = por %p1420_p7, %p1419_p13 }
  0x9c   : > { %p1422_p10 = pnand %p1421_p6, %p1415_p4 }
  0x9e   : > { %1425 = shalt.err (!%p1422_p10)
}
  0x9f   : > { %p2341_p12 = scmp.ne.s32.totalorder %s2328_s16, 0  ;;  %s2342_s9 = scalar_lea.sflag [#allocation17], %s1858_s17 }
  0xa0   : > { %s2343_s1 = sld [smem:[#allocation37_spill]]  ;;  %s408_s13 = scalar_lea.vmem [#allocation4], %s1851_s15 }
  0xa1   : > { %1250 = dma.hbm_to_vmem [thread:$0]  (!%p2341_p12), %s1965_s20, 128, %s556_s19, %s2342_s9  }
  0xa2   : > { %s415_s23 = sshll.u32 %s408_s13, 4  ;;  %s2001_s25 = scalar_lea.hbm %s2286_s3, %s1848_s14  ;;  %s1995_s23 = int_to_ptr.vmem [resolvable:$true] %s415_s23 }
  0xa3   : > { %s405_s4 = scalar_lea.sflag [#allocation5], %s1845_s30 }
  0xa6   : > { %s1992_s24 = scalar_lea.hbm %s2343_s1, %s1848_s14  ;;  %s1431_s2 = scalar_lea.hbm %s2343_s1, 256 }
  0xa7   : > { %s1426_s20 = scalar_lea.hbm %s1992_s24, 128  ;;  %p1432_p1 = scmp.lt.u32.totalorder %s1992_s24, %s2343_s1 }
  0xa8   : > { %p1427_p6 = scmp.ne.s32.totalorder %s1992_s24, %s1426_s20  ;;  %p1433_p3 = scmp.lt.u32.totalorder %s1431_s2, %s1426_s20 }
  0xa9   : > { %p1435_p2 = scmp.lt.u32.totalorder %s1426_s20, %s1992_s24 }
  0xaa   : > { %p1429_p8 = pnand %p1427_p6, %p1875_p5  ;;  %p1434_p11 = por %p1433_p3, %p1432_p1 }
  0xac   : > { %p1430_p9 = pneg %p1429_p8  ;;  %p1436_p0 = por %p1435_p2, %p1434_p11 }
  0xae   : > { %p1437_p4 = pnand %p1436_p0, %p1430_p9 }
  0xb0   : > { %1440 = shalt.err (!%p1437_p4)
}
  0xb1   : > { %s1441_s13 = scalar_lea.vmem %s1995_s23, 128  ;;  %s1701_s28 = smov [#allocation4]  }
  0xb2   : > { %p1442_p13 = scmp.ne.s32.totalorder %s1995_s23, %s1441_s13  ;;  %s1446_s26 = sshll.u32 %s1701_s28, 4  ;;  %s1447_s26 = int_to_ptr.vmem [resolvable:$false] %s1446_s26 }
  0xb3   : > { %s1448_s7 = scalar_lea.vmem %s1447_s26, 256  ;;  %p1449_p6 = scmp.lt.s32.totalorder %s1995_s23, %s1447_s26 }
  0xb4   : > { %p1444_p7 = pnand %p1442_p13, %p1875_p5  ;;  %p1450_p8 = scmp.lt.s32.totalorder %s1448_s7, %s1441_s13 }
  0xb6   : > { %p1445_p10 = pneg %p1444_p7  ;;  %p1451_p1 = por %p1450_p8, %p1449_p6 }
  0xb8   : > { %p1452_p3 = pnand %p1451_p1, %p1445_p10 }
  0xba   : > { %1455 = shalt.err (!%p1452_p3)
}
  0xbb   : > { %1229 = dma.hbm_to_vmem [thread:$0]  (!%p2341_p12), %s1992_s24, 128, %s1995_s23, %s405_s4  }
  0xbc   : > { %s444_s20 = scalar_lea.vmem [#allocation9], %s1851_s15  ;;  %s2030_s29 = scalar_lea.hbm %s2289_s6, %s1848_s14 }
  0xbd   : > { %s451_s19 = sshll.u32 %s444_s20, 4  ;;  %s1456_s13 = scalar_lea.hbm %s2001_s25, 128  ;;  %s452_s19 = int_to_ptr.vmem [resolvable:$true] %s451_s19 }
  0xbe   : > { %p1457_p9 = scmp.ne.s32.totalorder %s2001_s25, %s1456_s13  ;;  %s1461_s7 = scalar_lea.hbm %s2286_s3, 256 }
  0xbf   : > { %p1462_p0 = scmp.lt.u32.totalorder %s2001_s25, %s2286_s3  ;;  %p1463_p4 = scmp.lt.u32.totalorder %s1461_s7, %s1456_s13 }
  0xc0   : > { %p1459_p11 = pnand %p1457_p9, %p1875_p5  ;;  %p1465_p7 = scmp.lt.u32.totalorder %s1456_s13, %s2001_s25 }
  0xc1   : > { %p1464_p13 = por %p1463_p4, %p1462_p0 }
  0xc2   : > { %p1460_p2 = pneg %p1459_p11 }
  0xc3   : > { %p1466_p10 = por %p1465_p7, %p1464_p13 }
  0xc5   : > { %p1467_p6 = pnand %p1466_p10, %p1460_p2 }
  0xc7   : > { %1470 = shalt.err (!%p1467_p6)
}
  0xc8   : > { %s1471_s4 = scalar_lea.vmem %s452_s19, 128  ;;  %s1702_s24 = smov [#allocation9]  }
  0xc9   : > { %p1472_p8 = scmp.ne.s32.totalorder %s452_s19, %s1471_s4  ;;  %s1476_s23 = sshll.u32 %s1702_s24, 4  ;;  %s1477_s23 = int_to_ptr.vmem [resolvable:$false] %s1476_s23 }
  0xca   : > { %s1478_s20 = scalar_lea.vmem %s1477_s23, 256  ;;  %p1479_p9 = scmp.lt.s32.totalorder %s452_s19, %s1477_s23 }
  0xcb   : > { %p1474_p1 = pnand %p1472_p8, %p1875_p5  ;;  %p1480_p11 = scmp.lt.s32.totalorder %s1478_s20, %s1471_s4 }
  0xcd   : > { %p1475_p3 = pneg %p1474_p1  ;;  %p1481_p12 = por %p1480_p11, %p1479_p9 }
  0xcf   : > { %p1482_p0 = pnand %p1481_p12, %p1475_p3 }
  0xd1   : > { %1485 = shalt.err (!%p1482_p0)
}
  0xd2   : > { %p2344_p4 = scmp.ne.s32.totalorder %s2328_s16, 0  ;;  %s2345_s1 = scalar_lea.sflag [#allocation8], %s1858_s17 }
  0xd3   : > { %s487_s10 = scalar_lea.vmem [#allocation12], %s1851_s15  ;;  %s2056_s28 = scalar_lea.hbm %s2291_s8, %s1848_s14 }
  0xd4   : > { %1235 = dma.hbm_to_vmem [thread:$0]  (!%p2344_p4), %s2001_s25, 128, %s452_s19, %s2345_s1  }
  0xd5   : > { %s494_s9 = sshll.u32 %s487_s10, 4  ;;  %s1486_s26 = scalar_lea.hbm %s2030_s29, 128  ;;  %s495_s9 = int_to_ptr.vmem [resolvable:$true] %s494_s9 }
  0xd6   : > { %p1487_p12 = scmp.ne.s32.totalorder %s2030_s29, %s1486_s26  ;;  %s1491_s24 = scalar_lea.hbm %s2289_s6, 256 }
  0xd7   : > { %p1492_p7 = scmp.lt.u32.totalorder %s2030_s29, %s2289_s6  ;;  %p1493_p10 = scmp.lt.u32.totalorder %s1491_s24, %s1486_s26 }
  0xd8   : > { %p1489_p2 = pnand %p1487_p12, %p1875_p5  ;;  %p1495_p8 = scmp.lt.u32.totalorder %s1486_s26, %s2030_s29 }
  0xd9   : > { %p1494_p6 = por %p1493_p10, %p1492_p7 }
  0xda   : > { %p1490_p13 = pneg %p1489_p2 }
  0xdb   : > { %p1496_p1 = por %p1495_p8, %p1494_p6 }
  0xdd   : > { %p1497_p3 = pnand %p1496_p1, %p1490_p13 }
  0xdf   : > { %1500 = shalt.err (!%p1497_p3)
}
  0xe0   : > { %s1501_s25 = scalar_lea.vmem %s495_s9, 128  ;;  %s1703_s19 = smov [#allocation12]  }
  0xe1   : > { %p1502_p9 = scmp.ne.s32.totalorder %s495_s9, %s1501_s25  ;;  %s1506_s1 = sshll.u32 %s1703_s19, 4  ;;  %s1507_s1 = int_to_ptr.vmem [resolvable:$false] %s1506_s1 }
  0xe2   : > { %s1508_s10 = scalar_lea.vmem %s1507_s1, 256  ;;  %p1509_p12 = scmp.lt.s32.totalorder %s495_s9, %s1507_s1 }
  0xe3   : > { %p1504_p11 = pnand %p1502_p9, %p1875_p5  ;;  %p1510_p2 = scmp.lt.s32.totalorder %s1508_s10, %s1501_s25 }
  0xe5   : > { %p1505_p0 = pneg %p1504_p11  ;;  %p1511_p4 = por %p1510_p2, %p1509_p12 }
  0xe7   : > { %p1512_p7 = pnand %p1511_p4, %p1505_p0 }
  0xe9   : > { %1515 = shalt.err (!%p1512_p7)
}
  0xea   : > { %p2346_p10 = scmp.ne.s32.totalorder %s2328_s16, 0  ;;  %s2347_s2 = scalar_lea.sflag [#allocation11], %s1858_s17 }
  0xeb   : > { %s523_s13 = scalar_lea.vmem [#allocation15], %s1851_s15  ;;  %s2082_s24 = scalar_lea.hbm %s2294_s11, %s1848_s14 }
  0xec   : > { %1241 = dma.hbm_to_vmem [thread:$0]  (!%p2346_p10), %s2030_s29, 128, %s495_s9, %s2347_s2  }
  0xed   : > { %s530_s26 = sshll.u32 %s523_s13, 4  ;;  %s1516_s23 = scalar_lea.hbm %s2056_s28, 128  ;;  %s531_s26 = int_to_ptr.vmem [resolvable:$true] %s530_s26 }
  0xee   : > { %p1517_p4 = scmp.ne.s32.totalorder %s2056_s28, %s1516_s23  ;;  %s1521_s19 = scalar_lea.hbm %s2291_s8, 256 }
  0xef   : > { %p1522_p8 = scmp.lt.u32.totalorder %s2056_s28, %s2291_s8  ;;  %p1523_p1 = scmp.lt.u32.totalorder %s1521_s19, %s1516_s23 }
  0xf0   : > { %p1519_p13 = pnand %p1517_p4, %p1875_p5  ;;  %p1525_p9 = scmp.lt.u32.totalorder %s1516_s23, %s2056_s28 }
  0xf1   : > { %p1524_p3 = por %p1523_p1, %p1522_p8 }
  0xf2   : > { %p1520_p6 = pneg %p1519_p13 }
  0xf3   : > { %p1526_p11 = por %p1525_p9, %p1524_p3 }
  0xf5   : > { %p1527_p0 = pnand %p1526_p11, %p1520_p6 }
  0xf7   : > { %1530 = shalt.err (!%p1527_p0)
}
  0xf8   : > { %s1531_s29 = scalar_lea.vmem %s531_s26, 128  ;;  %s1704_s9 = smov [#allocation15]  }
  0xf9   : > { %p1532_p12 = scmp.ne.s32.totalorder %s531_s26, %s1531_s29  ;;  %s1536_s2 = sshll.u32 %s1704_s9, 4  ;;  %s1537_s2 = int_to_ptr.vmem [resolvable:$false] %s1536_s2 }
  0xfa   : > { %s1538_s13 = scalar_lea.vmem %s1537_s2, 256  ;;  %p1539_p4 = scmp.lt.s32.totalorder %s531_s26, %s1537_s2 }
  0xfb   : > { %p1534_p2 = pnand %p1532_p12, %p1875_p5  ;;  %p1540_p13 = scmp.lt.s32.totalorder %s1538_s13, %s1531_s29 }
  0xfd   : > { %p1535_p7 = pneg %p1534_p2  ;;  %p1541_p10 = por %p1540_p13, %p1539_p4 }
  0xff   : > { %p1542_p1 = pnand %p1541_p10, %p1535_p7 }
 0x101   : > { %1545 = shalt.err (!%p1542_p1)
}
 0x102   : > { %p2348_p8 = scmp.ne.s32.totalorder %s2328_s16, 0  ;;  %s2349_s7 = scalar_lea.sflag [#allocation14], %s1858_s17 }
 0x103   : > { %s566_s4 = scalar_lea.vmem [#allocation18], %s1851_s15  ;;  %s1546_s20 = scalar_lea.hbm %s2082_s24, 128 }
 0x104   : > { %1247 = dma.hbm_to_vmem [thread:$0]  (!%p2348_p8), %s2056_s28, 128, %s531_s26, %s2349_s7  }
 0x105   : > { %s573_s23 = sshll.u32 %s566_s4, 4  ;;  %p1547_p6 = scmp.ne.s32.totalorder %s2082_s24, %s1546_s20  ;;  %s574_s23 = int_to_ptr.vmem [resolvable:$true] %s573_s23 }
 0x106   : > { %s1551_s1 = scalar_lea.hbm %s2294_s11, 256  ;;  %p1552_p9 = scmp.lt.u32.totalorder %s2082_s24, %s2294_s11 }
 0x107   : > { %p1549_p10 = pnand %p1547_p6, %p1875_p5  ;;  %p1553_p11 = scmp.lt.u32.totalorder %s1551_s1, %s1546_s20 }
 0x108   : > { %p1555_p12 = scmp.lt.u32.totalorder %s1546_s20, %s2082_s24 }
 0x109   : > { %p1550_p3 = pneg %p1549_p10  ;;  %p1554_p0 = por %p1553_p11, %p1552_p9 }
 0x10b   : > { %p1556_p2 = por %p1555_p12, %p1554_p0 }
 0x10d   : > { %p1557_p7 = pnand %p1556_p2, %p1550_p3 }
 0x10f   : > { %1560 = shalt.err (!%p1557_p7)
}
 0x110   : > { %s1561_s28 = scalar_lea.vmem %s574_s23, 128  ;;  %s1705_s26 = smov [#allocation18]  }
 0x111   : > { %p1562_p4 = scmp.ne.s32.totalorder %s574_s23, %s1561_s28  ;;  %s1566_s9 = sshll.u32 %s1705_s26, 4  ;;  %s1567_s9 = int_to_ptr.vmem [resolvable:$false] %s1566_s9 }
 0x112   : > { %s1568_s2 = scalar_lea.vmem %s1567_s9, 256  ;;  %p1569_p6 = scmp.lt.s32.totalorder %s574_s23, %s1567_s9 }
 0x113   : > { %p1564_p13 = pnand %p1562_p4, %p1875_p5  ;;  %p1570_p10 = scmp.lt.s32.totalorder %s1568_s2, %s1561_s28 }
 0x115   : > { %p1565_p1 = pneg %p1564_p13  ;;  %p1571_p8 = por %p1570_p10, %p1569_p6 }
 0x117   : > { %p1572_p9 = pnand %p1571_p8, %p1565_p1 }
 0x119   : > { %1575 = shalt.err (!%p1572_p9)
}
 0x11a   : > { %p2350_p11 = scmp.ne.s32.totalorder %s2328_s16, 0  ;;  %s2351_s13 = scalar_lea.sflag [#allocation17], %s1858_s17 }
 0x11b   : > { %s2127_s20 = scalar_lea.hbm %s2295_s12, %s1848_s14  ;;  %s584_s25 = scalar_lea.vmem [#allocation19], %s1851_s15 }
 0x11c   : > { %1253 = dma.hbm_to_vmem [thread:$0]  (!%p2350_p11), %s2082_s24, 128, %s574_s23, %s2351_s13  }
 0x11d   : > { %s591_s19 = sshll.u32 %s584_s25, 4  ;;  %s581_s1 = scalar_lea.sflag [#allocation20], %s1845_s30  ;;  %s592_s19 = int_to_ptr.vmem [resolvable:$true] %s591_s19 }
 0x11e   : > { %s1576_s17 = scalar_lea.hbm %s2127_s20, 128  ;;  %s1581_s23 = scalar_lea.hbm %s2295_s12, 256 }
 0x11f   : > { %p1577_p8 = scmp.ne.s32.totalorder %s2127_s20, %s1576_s17  ;;  %p1582_p12 = scmp.lt.u32.totalorder %s2127_s20, %s2295_s12 }
 0x120   : > { %p1583_p2 = scmp.lt.u32.totalorder %s1581_s23, %s1576_s17  ;;  %p1585_p4 = scmp.lt.u32.totalorder %s1576_s17, %s2127_s20 }
 0x121   : > { %p1579_p3 = pnand %p1577_p8, %p1875_p5 }
 0x122   : > { %p1584_p7 = por %p1583_p2, %p1582_p12 }
 0x123   : > { %p1580_p0 = pneg %p1579_p3 }
 0x124   : > { %p1586_p13 = por %p1585_p4, %p1584_p7 }
 0x126   : > { %p1587_p1 = pnand %p1586_p13, %p1580_p0 }
 0x128   : > { %1590 = shalt.err (!%p1587_p1)
}
 0x129   : > { %s1591_s30 = scalar_lea.vmem %s592_s19, 128  ;;  %s1706_s15 = smov [#allocation19]  }
 0x12a   : > { %p1592_p6 = scmp.ne.s32.totalorder %s592_s19, %s1591_s30  ;;  %s1596_s28 = sshll.u32 %s1706_s15, 4  ;;  %s1597_s28 = int_to_ptr.vmem [resolvable:$false] %s1596_s28 }
 0x12b   : > { %s1598_s26 = scalar_lea.vmem %s1597_s28, 256  ;;  %p1599_p8 = scmp.lt.s32.totalorder %s592_s19, %s1597_s28 }
 0x12c   : > { %p1594_p10 = pnand %p1592_p6, %p1875_p5  ;;  %p1600_p3 = scmp.lt.s32.totalorder %s1598_s26, %s1591_s30 }
 0x12e   : > { %p1595_p9 = pneg %p1594_p10  ;;  %p1601_p11 = por %p1600_p3, %p1599_p8 }
 0x130   : > { %p1602_p2 = pnand %p1601_p11, %p1595_p9 }
 0x132   : > { %1605 = shalt.err (!%p1602_p2)
}
 0x133   : > { %p2352_p12 = scmp.ne.s32.totalorder %s2328_s16, 0  ;;  %p2353_p0 = scmp.ne.s32.totalorder %s2334_s22, 0 }
 0x134   : > { %s2151_s18 = sand.u32 (!%p2353_p0), 1, %s1686_s0   ;;  %p2354_p5 = scmp.ne.s32.totalorder (!%p2353_p0), %s2323_s27, 0 }
 0x135   : > { %1256 = dma.hbm_to_vmem [thread:$0]  (!%p2352_p12), %s2127_s20, 128, %s592_s19, %s581_s1  }
 0x136   : > { %600 = sbr.rel (%p2353_p0) target bundleno = 378 (0x17a), region = 68  ;;  %s2154_s9 = sshll.u32 (!%p2353_p0), %s2151_s18, 3 }
 0x137   : > { %s603_s2 = scalar_lea.sflag (!%p2353_p0), [#allocation5], %s2151_s18  ;;  %s606_s13 = scalar_lea.vmem (!%p2353_p0), [#allocation4], %s2154_s9 }
 0x13d   : > { %1653 = dma.done.wait (%p2354_p5), %s603_s2, 128  }
 0x13e   : > { %1655 = vsyncadd (%p2354_p5), %s603_s2, 4294967168  ;;  %s611_s16 = sand.u32 1, %s1811_s21   ;;  %s615_s7 = scalar_lea.vmem [#allocation7], %s2154_s9 }
 0x13f   : > { %s612_s22 = scalar_lea.sflag [#allocation8], %s611_s16 }
 0x140   : > { %1657 = dma.done.wait (%p2354_p5), %s612_s22, 256  }
 0x141   : > { %1659 = vsyncadd (%p2354_p5), %s612_s22, 4294967040  ;;  %s624_s4 = scalar_lea.vmem [#allocation9], %s2154_s9  ;;  %s630_s20 = scalar_lea.sflag [#allocation11], %s611_s16 }
 0x142   : > { %s633_s25 = scalar_lea.vmem [#allocation10], %s2154_s9 }
 0x143   : > { %1661 = dma.done.wait (%p2354_p5), %s630_s20, 256  }
 0x144   : > { %1663 = vsyncadd (%p2354_p5), %s630_s20, 4294967040  ;;  %s642_s19 = scalar_lea.vmem [#allocation12], %s2154_s9  ;;  %s648_s1 = scalar_lea.sflag [#allocation14], %s611_s16 }
 0x145   : > { %s651_s17 = scalar_lea.vmem [#allocation13], %s2154_s9 }
 0x146   : > { %1665 = dma.done.wait (%p2354_p5), %s648_s1, 256  }
 0x147   : > { %1667 = vsyncadd (%p2354_p5), %s648_s1, 4294967040  ;;  %s660_s10 = scalar_lea.vmem [#allocation15], %s2154_s9  ;;  %s666_s24 = scalar_lea.sflag [#allocation17], %s611_s16 }
 0x148   : > { %s669_s23 = scalar_lea.vmem [#allocation16], %s2154_s9 }
 0x149   : > { %1669 = dma.done.wait (%p2354_p5), %s666_s24, 256  }
 0x14a   : > { %1671 = vsyncadd (%p2354_p5), %s666_s24, 4294967040  ;;  %s684_s14 = scalar_lea.sflag [#allocation20], %s2151_s18 }
 0x14b   : > { %1673 = dma.done.wait (%p2354_p5), %s684_s14, 128  }
 0x14c   : > { %1675 = vsyncadd (%p2354_p5), %s684_s14, 4294967168  ;;  %p781_p11 = scmp.lt.s32.totalorder %s1811_s21, 1  ;;  %s789_s15 = sld [smem:[#allocation3]]  ;;  %v790_v0 = vld [vmem:[%s606_s13] sm:$0xff]  ;;  %v794_v2 = vld [vmem:[%s615_s7] sm:$0xff] }
 0x14d   : > { %s1189_s28 = sld [smem:[#allocation3 + $0x1]]  ;;  %s1190_s2 = sld [smem:[#allocation3 + $0x2]]  ;;  %v799_v6 = vld [vmem:[%s624_s4] sm:$0xff]  ;;  %v804_v7 = vld [vmem:[%s633_s25] sm:$0xff] }
 0x14e   : > { %s2195_s26 = scalar_select %p781_p11, %s1811_s21, 1  ;;  %v814_v15 = vld [vmem:[%s642_s19] sm:$0xff]  ;;  %v819_v19 = vld [vmem:[%s651_s17] sm:$0xff] }
 0x14f   : > { %s1191_s16 = sld [smem:[#allocation3 + $0x3]]  ;;  %s1192_s20 = sld [smem:[#allocation3 + $0x4]]  ;;  %v824_v23 = vld [vmem:[%s660_s10] sm:$0xff]  ;;  %v834_v31 = vld [vmem:[%s669_s23] sm:$0xff] }
 0x150   : > { %s1187_s22 = sshll.u32 %s2195_s26, 3  ;;  %s1193_s14 = sld [smem:[#allocation3 + $0x5]] }
 0x151   : > { %s784_s24 = scalar_lea.vmem %s2288_s5, %s1187_s22  ;;  %s2203_s30 = sld [smem:[#allocation3 + $0x6]] }
 0x152   : > { %v791_v1 = vstv %s789_s15  ;;  %s2209_s29 = sld [smem:[#allocation3 + $0x7]]  ;;  %v809_v10 = vld [vmem:[%s784_s24] sm:$0xff]  ;;  %s1196_s13 = sld [smem:[#allocation3 + $0x8]] }
 0x153   : > { %v795_v3 = vstv %s1189_s28  ;;  %v792_v4 = vmul.f32 %v791_v1, %v790_v0  ;;  %v800_v8 = vstv %s1190_s2  ;;  %s1197_s7 = sld [smem:[#allocation3 + $0x9]]  ;;  %s1198_s4 = sld [smem:[#allocation3 + $0xa]] }
 0x154   : > { %v796_v5 = vmul.f32 %v795_v3, %v794_v2  ;;  %v801_v12 = vmul.f32 %v800_v8, %v799_v6  ;;  %s2355_s28 = sld [smem:[#allocation41_spill]]  ;;  %s1199_s19 = sld [smem:[#allocation3 + $0xb]] }
 0x155   : > { %v805_v9 = vstv %s1191_s16  ;;  %v810_v14 = vstv %s1192_s20  ;;  %s2356_s17 = scalar_lea.vmem [#allocation18], %s2154_s9  ;;  %s2357_s10 = scalar_lea.vmem [#allocation19], %s2154_s9 }
 0x156   : > { %v797_v11 = vadd.f32 %v796_v5, %v792_v4  ;;  %v806_v13 = vmul.f32 %v805_v9, %v804_v7  ;;  %v811_v17 = vmul.f32 %v810_v14, %v809_v10  ;;  %v815_v18 = vstv %s1193_s14  ;;  %v839_v35 = vld [vmem:[%s2356_s17] sm:$0xff]  ;;  %v844_v39 = vld [vmem:[%s2357_s10] sm:$0xff]  ;;  %s1201_s26 = sshll.u32 %s1811_s21, 7  ;;  %s2359_s20 = sld [smem:[#allocation43_spill]] }
 0x157   : > { %v820_v20 = vstv %s2203_s30  ;;  %v816_v22 = vmul.f32 %v815_v18, %v814_v15  ;;  %s780_s30 = scalar_lea.vmem [#allocation21], %s2154_s9  ;;  %s850_s24 = scalar_lea.sflag [#allocation6], %s2151_s18 }
 0x158   : > { %v802_v16 = vadd.f32 %v801_v12, %v797_v11  ;;  %v825_v24 = vstv %s2209_s29  ;;  %v821_v26 = vmul.f32 %v820_v20, %v819_v19  ;;  %v830_v28 = vstv %s1196_s13  ;;  %s2358_s29 = sld [smem:[#allocation35_spill]]  ;;  %s863_s23 = sshll.u32 %s780_s30, 4  ;;  %s2236_s23 = int_to_ptr.vmem [resolvable:$true] %s863_s23 }
 0x159   : > { %v826_v30 = vmul.f32 %v825_v24, %v824_v23  ;;  %v835_v32 = vstv %s1197_s7  ;;  %v840_v36 = vstv %s1198_s4  ;;  %s1606_s14 = scalar_lea.vmem %s2236_s23, 128  ;;  %s1707_s21 = smov [#allocation21]  }
 0x15a   : > { %s788_s2 = scalar_lea.vmem %s2355_s28, %s1187_s22  ;;  %v807_v21 = vadd.f32 %v806_v13, %v802_v16  ;;  %v836_v38 = vmul.f32 %v835_v32, %v834_v31  ;;  %v845_v40 = vstv %s1199_s19  ;;  %v841_v42 = vmul.f32 %v840_v36, %v839_v35  ;;  %p1607_p7 = scmp.ne.s32.totalorder %s2236_s23, %s1606_s14 }
 0x15b   : > { %v829_v27 = vld [vmem:[%s788_s2] sm:$0xff]  ;;  %v846_v44 = vmul.f32 %v845_v40, %v844_v39  ;;  %s1610_s9 = sshll.u32 %s1707_s21, 4  ;;  %s1611_s9 = int_to_ptr.vmem [resolvable:$false] %s1610_s9 }
 0x15c   : > { %v812_v25 = vadd.f32 %v811_v17, %v807_v21  ;;  %v831_v34 = vmul.f32 %v830_v28, %v829_v27  ;;  %s2360_s27 = smov %s2359_s20  ;;  %s2241_s1 = scalar_lea.hbm %s2359_s20, %s1201_s26 }
 0x15d   : > { %s1612_s13 = scalar_lea.vmem %s1611_s9, 256  ;;  %p1613_p6 = scmp.lt.s32.totalorder %s2236_s23, %s1611_s9 }
 0x15e   : > { %v817_v29 = vadd.f32 %v816_v22, %v812_v25  ;;  %p2361_p4 = scmp.ne.s32.totalorder %s2358_s29, 0  ;;  %p1614_p10 = scmp.lt.s32.totalorder %s1612_s13, %s1606_s14 }
 0x160   : > { %v822_v33 = vadd.f32 %v821_v26, %v817_v29  ;;  %p1608_p13 = pnand %p1607_p7, %p2361_p4  ;;  %p1615_p9 = por %p1614_p10, %p1613_p6 }
 0x162   : > { %v827_v37 = vadd.f32 %v826_v30, %v822_v33  ;;  %p1609_p1 = pneg %p1608_p13 }
 0x164   : > { %v832_v41 = vadd.f32 %v831_v34, %v827_v37  ;;  %p1616_p8 = pnand %p1615_p9, %p1609_p1 }
 0x166   : > { %v837_v43 = vadd.f32 %v836_v38, %v832_v41 }
 0x168   : > { %v842_v45 = vadd.f32 %v841_v42, %v837_v43 }
 0x16a   : > { %v847_v46 = vadd.f32 %v846_v44, %v842_v45 }
 0x16c   : > { %848 = vst [vmem:[%s780_s30] sm:$0xff] %v847_v46 }
 0x16d   : > { %1619 = shalt.err (!%p1616_p8)
}
 0x16e   : > { %s1620_s18 = scalar_lea.hbm %s2241_s1, 128  ;;  %s1624_s25 = scalar_lea.hbm %s2360_s27, 256 }
 0x16f   : > { %p1621_p3 = scmp.ne.s32.totalorder %s2241_s1, %s1620_s18  ;;  %p1625_p0 = scmp.lt.u32.totalorder %s2241_s1, %s2360_s27 }
 0x170   : > { %p1626_p5 = scmp.lt.u32.totalorder %s1624_s25, %s1620_s18  ;;  %p1628_p7 = scmp.lt.u32.totalorder %s1620_s18, %s2241_s1 }
 0x171   : > { %p1622_p2 = pnand %p1621_p3, %p2361_p4 }
 0x172   : > { %p1627_p11 = por %p1626_p5, %p1625_p0 }
 0x173   : > { %p1623_p12 = pneg %p1622_p2 }
 0x174   : > { %p1629_p13 = por %p1628_p7, %p1627_p11 }
 0x176   : > { %p1630_p1 = pnand %p1629_p13, %p1623_p12 }
 0x178   : > { %1633 = shalt.err (!%p1630_p1)
}
 0x179   : > { %1224 = dma.vmem_to_hbm [thread:$0]  (%p2361_p4), %s2236_s23, 128, %s2241_s1, %s850_s24  }
 0x17a PF: > { %s2362_s2 = sld [smem:[#allocation30_spill]]  ;;  %s2363_s19 = sld [smem:[#allocation36_spill]] }
 0x17b   : > { %s2364_s17 = sld [smem:[#allocation32_spill]] }
 0x180   : > { %s875_s10 = sand.u32 1, %s2362_s2   ;;  %p2365_p6 = scmp.ne.s32.totalorder %s2363_s19, 0 }
 0x181   : > { %p2366_p10 = scmp.ge.s32.totalorder %s2364_s17, 2  ;;  %s876_s30 = scalar_lea.sflag [#allocation6], %s875_s10 }
 0x183   : > { %p1258_p9 = pnand %p2366_p10, %p2365_p6 }
 0x185   : > { %1677 = dma.done.wait (!%p1258_p9), %s876_s30, 128  }
 0x186   : > { %1679 = vsyncadd (!%p1258_p9), %s876_s30, 4294967168  ;;  %s2367_s20 = sld [smem:[#allocation33_spill]]  ;;  %s2368_s26 = sld [smem:[#allocation31_spill]] }
 0x187   : > { %s2369_s19 = sld [smem:[#allocation34_spill]]  ;;  %s2370_s18 = smov %s1686_s0 }
 0x18c   : > { %p45_p8 = scmp.ge.s32.totalorder %s2367_s20, 4   ;;  %s2371_s0 = smov %s2368_s26 }
 0x18e   :  { %47 = sbr.rel (!%p45_p8) target bundleno = 29 (0x1d), region = 228 }
 0x195   :  { %881 = vsyncpa [#allocation5], 1 }
 0x196   :  { %883 = vsyncpa [#allocation5 + $0x1], 1 }
 0x197   :  { %884 = vsyncpa [#allocation8], 1 }
 0x198   :  { %886 = vsyncpa [#allocation8 + $0x1], 1 }
 0x199   :  { %887 = vsyncpa [#allocation11], 1 }
 0x19a   :  { %889 = vsyncpa [#allocation11 + $0x1], 1 }
 0x19b   :  { %890 = vsyncpa [#allocation14], 1 }
 0x19c   :  { %892 = vsyncpa [#allocation14 + $0x1], 1 }
 0x19d   :  { %893 = vsyncpa [#allocation17], 1 }
 0x19e   :  { %895 = vsyncpa [#allocation17 + $0x1], 1 }
 0x19f   :  { %896 = vsyncpa [#allocation20], 1 }
 0x1a0   :  { %898 = vsyncpa [#allocation20 + $0x1], 1 }
 0x1a1   :  { %899 = vsyncpa [#allocation6], 1 }
 0x1a2   :  { %901 = vsyncpa [#allocation6 + $0x1], 1 }

</bundles_post_ra>
